<compile_context>
chip_gen: v7x
topology: tpu7x:2x2x1
jax: 0.10.0
libtpu: 0.0.40
codegen_flags: <defaults>
</compile_context>

<pallas_src>
import functools

import jax
import jax.numpy as jnp
from jax.experimental import pallas as pl
from jax.experimental.pallas import tpu as pltpu


def _detect_kernel(x_ref, gxy_ref, io_ref, *, anchors, stride):
    # x_ref  : (1, na, no, T)    raw predictions (VMEM tile)
    # gxy_ref: (2, T)            row 0 = grid_x, row 1 = grid_y for these lanes
    # io_ref : (1, na, no-1, T)  decoded [x, y, w, h, cls...] (objectness dropped)
    na = x_ref.shape[1]

    x = x_ref[0]                         # (na, no, T)
    sig = jax.nn.sigmoid(x)              # one dense EUP pass over the whole slab
    ewh = jnp.exp(x[:, 2:4, :])          # one EUP pass over the 2*na size rows
    gxy = gxy_ref[...]                   # (2, T)

    slabs = []
    for a in range(na):                  # na is small & static
        aw, ah = anchors[a]              # Python floats -> pure scalar multiplies
        xy = (sig[a, 0:2, :] + gxy) * stride           # (2, T)
        w = ewh[a, 0:1, :] * aw                         # (1, T)
        h = ewh[a, 1:2, :] * ah                         # (1, T)
        cls = sig[a, 5:, :] * sig[a, 4:5, :]            # (nc, T)  cls * objectness
        slabs.append(jnp.concatenate([xy, w, h, cls], axis=0))   # (no-1, T)

    # Single coalesced store of the full output tile for this grid step.
    io_ref[0] = jnp.stack(slabs, axis=0)                # (na, no-1, T)


def detect_layer_inference(p, anchors, img_size, *, tile_s=1024):
    """Pallas implementation of detect_layer.forward with phase='inference'.

    p: (bs, na*no, ny, nx) float32 (NCHW, same as the PyTorch module)
    anchors: (na, 2) anchor w/h in pixels (static module buffer)
    Returns (io[..., oi].reshape(bs, -1, no-1), p_permuted) like the module.
    """
    bs, ch, ny, nx = p.shape
    anchors_py = tuple((float(w), float(h)) for w, h in jnp.asarray(anchors).tolist())
    na = len(anchors_py)
    no = ch // na
    nc = no - 5
    assert nc >= 1, "nc == 0 (no == 5) is not supported"
    S = ny * nx
    stride = float(max(img_size)) / float(max(nx, ny))

    # Lane-align the flattened spatial axis and pick the spatial tile size.
    tile_s = max(128, min(tile_s, pl.cdiv(S, 128) * 128))
    assert tile_s % 128 == 0
    n_s = pl.cdiv(S, tile_s)
    S_pad = n_s * tile_s

    x = p.reshape(bs, na, no, S)
    if S_pad != S:
        x = jnp.pad(x, ((0, 0), (0, 0), (0, 0), (0, S_pad - S)))

    # Host-precomputed spatial grid (y-major flatten): lane i -> (i % nx, i // nx).
    idx = jnp.arange(S_pad, dtype=jnp.int32)
    gxy = jnp.stack([idx % nx, idx // nx], axis=0).astype(p.dtype)   # (2, S_pad)

    # TODO(synk): optional bf16 I/O path for v6e/v7x (halves HBM bytes); kept
    # f32 here to preserve exact parity with the reference decode.
    kernel = functools.partial(_detect_kernel, anchors=anchors_py, stride=stride)

    io = pl.pallas_call(
        kernel,
        out_shape=jax.ShapeDtypeStruct((bs, na, no - 1, S_pad), p.dtype),
        grid_spec=pltpu.PrefetchScalarGridSpec(
            num_scalar_prefetch=0,
            grid=(bs, n_s),
            in_specs=[
                pl.BlockSpec((1, na, no, tile_s), lambda b, s: (b, 0, 0, s)),
                pl.BlockSpec((2, tile_s), lambda b, s: (0, s)),
            ],
            out_specs=pl.BlockSpec((1, na, no - 1, tile_s),
                                   lambda b, s: (b, 0, 0, s)),
        ),
        compiler_params=pltpu.CompilerParams(
            dimension_semantics=("parallel", "parallel")),
    )(x, gxy)

    # ---- glue: back to the PyTorch return convention ------------------------
    # TODO(synk): if the NMS/postproc consumer can read the lane-dense
    # (bs, na, no-1, S) layout directly, drop this transpose (it is an extra
    # full HBM pass that can cost as much as the kernel itself).
    io_sel = io[..., :S].transpose(0, 1, 3, 2).reshape(bs, na * S, no - 1)
    p_perm = p.reshape(bs, na, no, ny, nx).transpose(0, 1, 3, 4, 2)
    return io_sel, p_perm


def _reference(p, anchors, img_size):
    """Pure-JAX mirror of the PyTorch forward (phase='inference') for checking."""
    bs, ch, ny, nx = p.shape
    na = anchors.shape[0]
    no = ch // na
    stride = float(max(img_size)) / float(max(nx, ny))
    yv, xv = jnp.meshgrid(jnp.arange(ny), jnp.arange(nx), indexing="ij")
    grid_xy = jnp.stack((xv, yv), 2).astype(p.dtype).reshape(1, 1, ny, nx, 2)
    anchor_wh = (anchors.astype(p.dtype) / stride).reshape(1, na, 1, 1, 2)
    pp = p.reshape(bs, na, no, ny, nx).transpose(0, 1, 3, 4, 2)
    xy = jax.nn.sigmoid(pp[..., 0:2]) + grid_xy
    wh = jnp.exp(pp[..., 2:4]) * anchor_wh
    xywh = jnp.concatenate([xy, wh], -1) * stride
    rest = jax.nn.sigmoid(pp[..., 4:])
    obj = rest[..., 0:1]
    cls = rest[..., 1:] * obj
    io = jnp.concatenate([xywh, obj, cls], -1)
    oi = [0, 1, 2, 3] + list(range(5, no))
    return io[..., jnp.array(oi)].reshape(bs, -1, no - 1), pp


if __name__ == "__main__":
    key = jax.random.PRNGKey(0)
    anchors = jnp.array([[10.0, 13.0], [16.0, 30.0], [33.0, 23.0]], jnp.float32)
    na = anchors.shape[0]
    nc = 2                      # number of classes
    no = nc + 5                 # = 7
    bs, ny, nx = 2, 16, 16
    img_size = (256, 256)       # -> stride = 16

    p = 0.5 * jax.random.normal(key, (bs, na * no, ny, nx), dtype=jnp.float32)

    # tile_s=128 -> grid (bs=2, S/128=2): 4 pipeline steps even at this toy size.
    io_sel, p_perm = detect_layer_inference(p, anchors, img_size, tile_s=128)
    io_sel = jax.block_until_ready(io_sel)
    p_perm = jax.block_until_ready(p_perm)

    io_ref, p_ref = _reference(p, anchors, img_size)
    assert io_sel.shape == (bs, na * ny * nx, no - 1)
    assert p_perm.shape == (bs, na, ny, nx, no)
    assert jnp.allclose(io_sel, io_ref, atol=1e-5, rtol=1e-5)
    assert jnp.allclose(p_perm, p_ref, atol=1e-6, rtol=1e-6)
    print("KERNEL_OK")
</pallas_src>

<mosaic_0001>
module attributes {stable_mosaic.version = 11 : i64} {
  func.func @_detect_kernel(%arg0: i32, %arg1: i32, %arg2: memref<1x3x7x128xf32, #tpu.memory_space<vmem>>, %arg3: memref<2x128xf32, #tpu.memory_space<vmem>>, %arg4: memref<1x3x6x128xf32, #tpu.memory_space<vmem>>) attributes {dimension_semantics = [#tpu.dimension_semantics<parallel>, #tpu.dimension_semantics<parallel>], iteration_bounds = array<i64: 2, 2>, scalar_prefetch = 0 : i64, scratch_operands = 0 : i64, tpu.core_type = #tpu.core_type<tc>, window_params = [{transform_indices = @transform_0, window_bounds = array<i64: 1, 3, 7, 128>}, {transform_indices = @transform_1, window_bounds = array<i64: 2, 128>}, {transform_indices = @transform_2, window_bounds = array<i64: 1, 3, 6, 128>}]} {
    %c0 = arith.constant 0 : index
    %c0_0 = arith.constant 0 : index
    %c0_1 = arith.constant 0 : index
    %c0_2 = arith.constant 0 : index
    %0 = vector.load %arg2[%c0, %c0_0, %c0_1, %c0_2] : memref<1x3x7x128xf32, #tpu.memory_space<vmem>>, vector<1x3x7x128xf32>
    %1 = vector.shape_cast %0 : vector<1x3x7x128xf32> to vector<3x7x128xf32>
    %2 = arith.negf %1 : vector<3x7x128xf32>
    %3 = math.exp %2 : vector<3x7x128xf32>
    %cst = arith.constant 1.000000e+00 : f32
    %4 = vector.broadcast %cst : f32 to vector<3x7x128xf32>
    %5 = arith.addf %4, %3 : vector<3x7x128xf32>
    %6 = arith.divf %4, %5 : vector<3x7x128xf32>
    %7 = vector.extract_strided_slice %1 {offsets = [0, 2, 0], sizes = [3, 2, 128], strides = [1, 1, 1]} : vector<3x7x128xf32> to vector<3x2x128xf32>
    %8 = math.exp %7 : vector<3x2x128xf32>
    %c0_3 = arith.constant 0 : index
    %c0_4 = arith.constant 0 : index
    %9 = vector.load %arg3[%c0_3, %c0_4] : memref<2x128xf32, #tpu.memory_space<vmem>>, vector<2x128xf32>
    %10 = vector.extract_strided_slice %6 {offsets = [0, 0, 0], sizes = [1, 2, 128], strides = [1, 1, 1]} : vector<3x7x128xf32> to vector<1x2x128xf32>
    %11 = vector.shape_cast %10 : vector<1x2x128xf32> to vector<2x128xf32>
    %12 = arith.addf %11, %9 : vector<2x128xf32>
    %cst_5 = arith.constant 1.600000e+01 : f32
    %13 = vector.broadcast %cst_5 : f32 to vector<2x128xf32>
    %14 = arith.mulf %12, %13 : vector<2x128xf32>
    %15 = vector.extract_strided_slice %8 {offsets = [0, 0, 0], sizes = [1, 1, 128], strides = [1, 1, 1]} : vector<3x2x128xf32> to vector<1x1x128xf32>
    %16 = vector.shape_cast %15 : vector<1x1x128xf32> to vector<1x128xf32>
    %cst_6 = arith.constant 1.000000e+01 : f32
    %17 = vector.broadcast %cst_6 : f32 to vector<1x128xf32>
    %18 = arith.mulf %16, %17 : vector<1x128xf32>
    %19 = vector.extract_strided_slice %8 {offsets = [0, 1, 0], sizes = [1, 1, 128], strides = [1, 1, 1]} : vector<3x2x128xf32> to vector<1x1x128xf32>
    %20 = vector.shape_cast %19 : vector<1x1x128xf32> to vector<1x128xf32>
    %cst_7 = arith.constant 1.300000e+01 : f32
    %21 = vector.broadcast %cst_7 : f32 to vector<1x128xf32>
    %22 = arith.mulf %20, %21 : vector<1x128xf32>
    %23 = vector.extract_strided_slice %6 {offsets = [0, 5, 0], sizes = [1, 2, 128], strides = [1, 1, 1]} : vector<3x7x128xf32> to vector<1x2x128xf32>
    %24 = vector.shape_cast %23 : vector<1x2x128xf32> to vector<2x128xf32>
    %25 = vector.extract_strided_slice %6 {offsets = [0, 4, 0], sizes = [1, 1, 128], strides = [1, 1, 1]} : vector<3x7x128xf32> to vector<1x1x128xf32>
    %26 = vector.shape_cast %25 : vector<1x1x128xf32> to vector<1x128xf32>
    %27 = vector.broadcast %26 : vector<1x128xf32> to vector<2x128xf32>
    %28 = arith.mulf %24, %27 : vector<2x128xf32>
    %29 = tpu.concatenate %14, %18, %22, %28 in 0 : vector<2x128xf32>, vector<1x128xf32>, vector<1x128xf32>, vector<2x128xf32> -> vector<6x128xf32>
    %30 = vector.extract_strided_slice %6 {offsets = [1, 0, 0], sizes = [1, 2, 128], strides = [1, 1, 1]} : vector<3x7x128xf32> to vector<1x2x128xf32>
    %31 = vector.shape_cast %30 : vector<1x2x128xf32> to vector<2x128xf32>
    %32 = arith.addf %31, %9 : vector<2x128xf32>
    %cst_8 = arith.constant 1.600000e+01 : f32
    %33 = vector.broadcast %cst_8 : f32 to vector<2x128xf32>
    %34 = arith.mulf %32, %33 : vector<2x128xf32>
    %35 = vector.extract_strided_slice %8 {offsets = [1, 0, 0], sizes = [1, 1, 128], strides = [1, 1, 1]} : vector<3x2x128xf32> to vector<1x1x128xf32>
    %36 = vector.shape_cast %35 : vector<1x1x128xf32> to vector<1x128xf32>
    %cst_9 = arith.constant 1.600000e+01 : f32
    %37 = vector.broadcast %cst_9 : f32 to vector<1x128xf32>
    %38 = arith.mulf %36, %37 : vector<1x128xf32>
    %39 = vector.extract_strided_slice %8 {offsets = [1, 1, 0], sizes = [1, 1, 128], strides = [1, 1, 1]} : vector<3x2x128xf32> to vector<1x1x128xf32>
    %40 = vector.shape_cast %39 : vector<1x1x128xf32> to vector<1x128xf32>
    %cst_10 = arith.constant 3.000000e+01 : f32
    %41 = vector.broadcast %cst_10 : f32 to vector<1x128xf32>
    %42 = arith.mulf %40, %41 : vector<1x128xf32>
    %43 = vector.extract_strided_slice %6 {offsets = [1, 5, 0], sizes = [1, 2, 128], strides = [1, 1, 1]} : vector<3x7x128xf32> to vector<1x2x128xf32>
    %44 = vector.shape_cast %43 : vector<1x2x128xf32> to vector<2x128xf32>
    %45 = vector.extract_strided_slice %6 {offsets = [1, 4, 0], sizes = [1, 1, 128], strides = [1, 1, 1]} : vector<3x7x128xf32> to vector<1x1x128xf32>
    %46 = vector.shape_cast %45 : vector<1x1x128xf32> to vector<1x128xf32>
    %47 = vector.broadcast %46 : vector<1x128xf32> to vector<2x128xf32>
    %48 = arith.mulf %44, %47 : vector<2x128xf32>
    %49 = tpu.concatenate %34, %38, %42, %48 in 0 : vector<2x128xf32>, vector<1x128xf32>, vector<1x128xf32>, vector<2x128xf32> -> vector<6x128xf32>
    %50 = vector.extract_strided_slice %6 {offsets = [2, 0, 0], sizes = [1, 2, 128], strides = [1, 1, 1]} : vector<3x7x128xf32> to vector<1x2x128xf32>
    %51 = vector.shape_cast %50 : vector<1x2x128xf32> to vector<2x128xf32>
    %52 = arith.addf %51, %9 : vector<2x128xf32>
    %cst_11 = arith.constant 1.600000e+01 : f32
    %53 = vector.broadcast %cst_11 : f32 to vector<2x128xf32>
    %54 = arith.mulf %52, %53 : vector<2x128xf32>
    %55 = vector.extract_strided_slice %8 {offsets = [2, 0, 0], sizes = [1, 1, 128], strides = [1, 1, 1]} : vector<3x2x128xf32> to vector<1x1x128xf32>
    %56 = vector.shape_cast %55 : vector<1x1x128xf32> to vector<1x128xf32>
    %cst_12 = arith.constant 3.300000e+01 : f32
    %57 = vector.broadcast %cst_12 : f32 to vector<1x128xf32>
    %58 = arith.mulf %56, %57 : vector<1x128xf32>
    %59 = vector.extract_strided_slice %8 {offsets = [2, 1, 0], sizes = [1, 1, 128], strides = [1, 1, 1]} : vector<3x2x128xf32> to vector<1x1x128xf32>
    %60 = vector.shape_cast %59 : vector<1x1x128xf32> to vector<1x128xf32>
    %cst_13 = arith.constant 2.300000e+01 : f32
    %61 = vector.broadcast %cst_13 : f32 to vector<1x128xf32>
    %62 = arith.mulf %60, %61 : vector<1x128xf32>
    %63 = vector.extract_strided_slice %6 {offsets = [2, 5, 0], sizes = [1, 2, 128], strides = [1, 1, 1]} : vector<3x7x128xf32> to vector<1x2x128xf32>
    %64 = vector.shape_cast %63 : vector<1x2x128xf32> to vector<2x128xf32>
    %65 = vector.extract_strided_slice %6 {offsets = [2, 4, 0], sizes = [1, 1, 128], strides = [1, 1, 1]} : vector<3x7x128xf32> to vector<1x1x128xf32>
    %66 = vector.shape_cast %65 : vector<1x1x128xf32> to vector<1x128xf32>
    %67 = vector.broadcast %66 : vector<1x128xf32> to vector<2x128xf32>
    %68 = arith.mulf %64, %67 : vector<2x128xf32>
    %69 = tpu.concatenate %54, %58, %62, %68 in 0 : vector<2x128xf32>, vector<1x128xf32>, vector<1x128xf32>, vector<2x128xf32> -> vector<6x128xf32>
    %70 = vector.shape_cast %29 : vector<6x128xf32> to vector<1x6x128xf32>
    %71 = vector.shape_cast %49 : vector<6x128xf32> to vector<1x6x128xf32>
    %72 = vector.shape_cast %69 : vector<6x128xf32> to vector<1x6x128xf32>
    %73 = tpu.concatenate %70, %71, %72 in 0 : vector<1x6x128xf32>, vector<1x6x128xf32>, vector<1x6x128xf32> -> vector<3x6x128xf32>
    %c0_14 = arith.constant 0 : index
    %c0_15 = arith.constant 0 : index
    %c0_16 = arith.constant 0 : index
    %c0_17 = arith.constant 0 : index
    %74 = vector.load %arg4[%c0_14, %c0_15, %c0_16, %c0_17] : memref<1x3x6x128xf32, #tpu.memory_space<vmem>>, vector<1x3x6x128xf32>
    %75 = vector.shape_cast %74 : vector<1x3x6x128xf32> to vector<3x6x128xf32>
    %76 = vector.shape_cast %73 : vector<3x6x128xf32> to vector<1x3x6x128xf32>
    tpu.vector_store %arg4[%c0_14, %c0_15, %c0_16, %c0_17], %76 {strides = array<i32>} : memref<1x3x6x128xf32, #tpu.memory_space<vmem>>, vector<1x3x6x128xf32>,
    return
  }
  func.func @transform_0(%arg0: i32, %arg1: i32) -> (i32, i32, i32, i32) {
    %c0_i32 = arith.constant 0 : i32
    %c0_i32_0 = arith.constant 0 : i32
    %c0_i32_1 = arith.constant 0 : i32
    return %arg0, %c0_i32, %c0_i32_0, %arg1 : i32, i32, i32, i32
  }
  func.func @transform_1(%arg0: i32, %arg1: i32) -> (i32, i32) {
    %c0_i32 = arith.constant 0 : i32
    %c0_i32_0 = arith.constant 0 : i32
    return %c0_i32, %arg1 : i32, i32
  }
  func.func @transform_2(%arg0: i32, %arg1: i32) -> (i32, i32, i32, i32) {
    %c0_i32 = arith.constant 0 : i32
    %c0_i32_0 = arith.constant 0 : i32
    %c0_i32_1 = arith.constant 0 : i32
    return %arg0, %c0_i32, %c0_i32_0, %arg1 : i32, i32, i32, i32
  }
}

</mosaic_0001>

<bundles_post_ra>
// kernel: tpu_custom_call.1
= control target key start
LH: loop header
LB: loop body
LE: loop exit
PB: predicated region body
PF: predicated region fallthrough
CT: control target
= control target key end

     0   :  { %s591_s9 = smov 0   ;;  %s593_s10 = smov 0   ;;  %s705_s0 = inlined_call_operand.vmem [shape: f32[2,3,7,256], index: 0, kind: input, shape index: {}]   ;;  %s706_s1 = inlined_call_operand.vmem [shape: f32[2,256], index: 1, kind: input, shape index: {}]   ;;  %s707_s2 = inlined_call_operand.vmem [shape: f32[2,3,6,256], index: 2, kind: output, shape index: {}]  }
   0x1   :  { %s595_s11 = smov 0   ;;  %s597_s12 = smov 0  }
   0x2   :  { %s599_s13 = smov 0   ;;  %s601_s14 = smov 0  }
   0x3   :  { %s603_s15 = smov 0  }
   0x4 LB: > { %s21_s16 = sadd.s32 1, %s566_s13  ;;  %s24_s17 = sadd.s32 1, %s570_s14  ;;  %s574_s15 = sphi %s603_s15, %s12_s15   ;;  %s570_s14 = sphi %s601_s14, %s714_s14   ;;  %s566_s13 = sphi %s599_s13, %s713_s13   ;;  %s562_s12 = sphi %s597_s12, %s712_s12   ;;  %s558_s11 = sphi %s595_s11, %s711_s11   ;;  %s554_s10 = sphi %s593_s10, %s710_s10   ;;  %s550_s9 = sphi %s591_s9, %s709_s9  }
   0x5   : > { %p22_p0 = scmp.ge.s32.totalorder %s21_s16, 2  ;;  %s429_s18 = sadd.s32 4294967295, %s574_s15  }
   0x6   : > { %p40_p1 = scmp.ne.s32.totalorder %s554_s10, %s550_s9  ;;  %p41_p2 = scmp.eq.s32.totalorder %s574_s15, 0 }
   0x7   : > { %s716_s16 = smov (%p22_p0, %s21_s16), 0  ;;  %s718_s17 = smov (!%p22_p0, %s24_s17), %s570_s14 }
   0x8   : > { %p26_p3 = scmp.ge.s32.totalorder %s718_s17, 2  ;;  %p98_p4 = scmp.eq.s32.totalorder %s429_s18, 3 }
   0x9   : > { %s29_s19 = ssub.s32 %s566_s13, %s716_s16  ;;  %p42_p5 = por %p41_p2, %p40_p1 }
   0xa   : > { %s720_s17 = smov (%p26_p3, %s718_s17), 0  ;;  %p639_p6 = por %p98_p4, %p40_p1 }
   0xb   : > { %s28_s21 = ssub.s32 %s570_s14, %s720_s17  ;;  %s33_s23 = sadd.s32 1, %s554_s10 }
   0xc   : > { %s30_s22 = sor.u32 %s29_s19, %s28_s21  ;;  %p432_p8 = scmp.ge.s32.totalorder %s574_s15, 4 }
   0xd   : > { %p31_p7 = scmp.eq.s32.totalorder %s30_s22, 0 }
   0xe   : > { %120 = sbr.rel (%p432_p8) target bundleno = 30 (0x1e), region = 16 }
   0xf   : > { %s647_s24 = scalar_select %p31_p7, %s554_s10, %s33_s23  }
  0x15   : > { %123 = sbr.rel (!%p42_p5) target bundleno = 30 (0x1e), region = 20  ;;  %s125_s25 = sand.u32 (%p42_p5), 1, %s554_s10  }
  0x16   : > { %s443_s26 = smul.u32 (%p42_p5), 6, %s570_s14 }
  0x17   : > { %s442_s27 = smul.u32 (%p42_p5), 24, %s125_s25 }
  0x18   : > { %s129_s28 = sadd.s32 (%p42_p5), %s566_s13, %s443_s26 }
  0x19   : > { %s433_s29 = sshll.u32 (%p42_p5), %s129_s28, 3  ;;  %s127_s5 = scalar_lea.vmem (%p42_p5), [#allocation2], %s442_s27 }
  0x1a   : > { %s131_s4 = scalar_lea.vmem (%p42_p5), %s705_s0, %s433_s29 }
  0x1b   : > { %v163_v0 = vld [vmem:[%s131_s4] sm:$0xff] (%p42_p5)  ;;  %v165_v1 = vld [vmem:[%s131_s4 + $0x10] sm:$0xff] (%p42_p5) }
  0x1c   : > { %v167_v2 = vld [vmem:[%s131_s4 + $0x20] sm:$0xff]  ;;  %164 = vst [vmem:[%s127_s5] sm:$0xff] %v163_v0  ;;  %166 = vst [vmem:[%s127_s5 + $0x8] sm:$0xff] %v165_v1 }
  0x1d   : > { %168 = vst [vmem:[%s127_s5 + $0x10] sm:$0xff] %v167_v2 }
  0x1e PF: > { %p434_p9 = scmp.ge.s32.totalorder %s574_s15, 1  ;;  %p180_p10 = scmp.lt.s32.totalorder %s574_s15, 5 }
  0x20   : > { %p181_p11 = pnand %p434_p9, %p180_p10 }
  0x21   : > { %s187_s6 = sand.u32 (!%p181_p11), 1, %s550_s9   ;;  %p211_p12 = scmp.lt.s32.totalorder (!%p181_p11), %s558_s11, 1  ;;  %v247_v17 = vlaneseq (!%p181_p11)  ;;  %vm255_vm0 = vcmask (!%p181_p11), 1041408   ;;  %vm257_vm1 = vcmask (!%p181_p11), 1042432   ;;  %vm259_vm2 = vcmask (!%p181_p11), 1043456  }
  0x22   : > { %184 = sbr.rel (%p181_p11) target bundleno = 83 (0x53), region = 62 }
  0x23   : > { %s659_s7 = smul.u32 (!%p181_p11), 24, %s187_s6  ;;  %v248_v19 = vshrl.u32 (!%p181_p11), %v247_v17, 7 }
  0x25   : > { %s189_s8 = scalar_lea.vmem (!%p181_p11), [#allocation2], %s659_s7  ;;  %v249_v21 = vsub.s32 (!%p181_p11), 4, %v248_v19  ;;  %s210_s23 = scalar_lea.vmem (!%p181_p11), [#allocation3], %s659_s7 }
  0x26   : > { %v215_v3 = vld [vmem:[%s189_s8] sm:$0x7f] (!%p181_p11)  ;;  %v216_v4 = vld [vmem:[%s189_s8 + $0x8] sm:$0x7f] (!%p181_p11)  ;;  %v217_v5 = vld [vmem:[%s189_s8 + $0x10] sm:$0x7f] (!%p181_p11) }
  0x27   : > { %v436_v6 = vmul.f32 (!%p181_p11), -1.442695, %v215_v3  ;;  %v437_v7 = vmul.f32 (!%p181_p11), -1.442695, %v216_v4  ;;  %v438_v8 = vmul.f32 (!%p181_p11), -1.442695, %v217_v5 }
  0x28   : > { %v236_v9 = vmul.f32 (!%p181_p11), 1.442695, %v215_v3  ;;  %v238_v10 = vmul.f32 (!%p181_p11), 1.442695, %v216_v4  ;;  %v240_v11 = vmul.f32 (!%p181_p11), 1.442695, %v217_v5 }
  0x29   : > { %502 = vpow2.f32 %v436_v6  ;;  %s212_s9 = scalar_select %p211_p12, %s558_s11, 1 }
  0x2a   : > { %504 = vpow2.f32 %v437_v7  ;;  %s445_s25 = smul.u32 (%p639_p6), 6, %s562_s12 }
  0x2b   : > { %506 = vpow2.f32 %v438_v8  ;;  %s435_s18 = sshll.u32 %s212_s9, 1 }
  0x2c   : > { %508 = vpow2.f32 %v236_v9  ;;  %s214_s22 = scalar_lea.vmem %s706_s1, %s435_s18  ;;  %s302_s26 = sadd.s32 (%p639_p6), %s558_s11, %s445_s25 }
  0x2d   : > { %510 = vpow2.f32 %v238_v10  ;;  %v242_v23 = vld [vmem:[%s214_s22] sm:$0x3]  ;;  %s439_s27 = sshll.u32 (%p639_p6), %s302_s26, 3 }
  0x2e   : > { %512 = vpow2.f32 %v240_v11  ;;  %s304_s30 = scalar_lea.vmem (%p639_p6), %s707_s2, %s439_s27 }
  0x33   : > { %v503_v12 = vpop.eup %502 }
  0x34   : > { %v505_v13 = vpop.eup %504  ;;  %v227_v14 = vadd.f32 1.0, %v503_v12 }
  0x35   : > { %v507_v15 = vpop.eup %506  ;;  %v228_v16 = vadd.f32 1.0, %v505_v13 }
  0x36   : > { %v229_v18 = vadd.f32 1.0, %v507_v15  ;;  %514 = vrcp.f32 %v227_v14  ;;  %v509_v20 = vpop.eup %508 }
  0x37   : > { %516 = vrcp.f32 %v228_v16  ;;  %v511_v22 = vpop.eup %510  ;;  %v245_v26 = vmul.f32 10.0, %v509_v20  ;;  %v246_v29 = vmul.f32 13.0, %v509_v20 }
  0x38   : > { %518 = vrcp.f32 %v229_v18  ;;  %v513_v24 = vpop.eup %512  ;;  %v263_v31 = vmul.f32 16.0, %v511_v22  ;;  %v264_v34 = vmul.f32 30.0, %v511_v22 }
  0x39   : > { %v278_v36 = vmul.f32 33.0, %v513_v24  ;;  %v279_v43 = vmul.f32 23.0, %v513_v24 }
  0x40   : > { %v515_v25 = vpop.eup %514 }
  0x41   : > { %v517_v27 = vpop.eup %516  ;;  %v243_v28 = vadd.f32 %v515_v25, %v242_v23  ;;  %v250_v30 = vrot.slane %v515_v25, %v249_v21 }
  0x42   : > { %v519_v32 = vpop.eup %518  ;;  %v261_v33 = vadd.f32 %v517_v27, %v242_v23  ;;  %v268_v35 = vrot.slane %v517_v27, %v249_v21 }
  0x43   : > { %v244_v37 = vmul.f32 16.0, %v243_v28  ;;  %v251_v38 = vmul.f32 %v515_v25, %v250_v30  ;;  %v276_v39 = vadd.f32 %v519_v32, %v242_v23  ;;  %v283_v40 = vrot.slane %v519_v32, %v249_v21 }
  0x44   : > { %v262_v41 = vmul.f32 16.0, %v261_v33  ;;  %v269_v42 = vmul.f32 %v517_v27, %v268_v35  ;;  %300 = sbr.rel (!%p639_p6) target bundleno = 83 (0x53), region = 70 }
  0x45   : > { %v253_v44 = vrot.slane %v251_v38, 1  ;;  %v256_v45 = vsel %vm255_vm0, %v244_v37, %v245_v26  ;;  %v277_v46 = vmul.f32 16.0, %v276_v39  ;;  %v284_v47 = vmul.f32 %v519_v32, %v283_v40 }
  0x46   : > { %v258_v48 = vsel %vm257_vm1, %v256_v45, %v246_v29  ;;  %v271_v49 = vrot.slane %v269_v42, 1  ;;  %v273_v50 = vsel %vm255_vm0, %v262_v41, %v263_v31 }
  0x47   : > { %v260_v51 = vsel %vm259_vm2, %v258_v48, %v253_v44  ;;  %v274_v52 = vsel %vm257_vm1, %v273_v50, %v264_v34  ;;  %v286_v53 = vrot.slane %v284_v47, 1  ;;  %v288_v54 = vsel %vm255_vm0, %v277_v46, %v278_v36 }
  0x48   : > { %291 = vst [vmem:[%s210_s23] sm:$0x3f] %v260_v51  ;;  %v275_v55 = vsel %vm259_vm2, %v274_v52, %v271_v49  ;;  %v289_v56 = vsel %vm257_vm1, %v288_v54, %v279_v43 }
  0x49   : > { %292 = vst [vmem:[%s210_s23 + $0x8] sm:$0x3f] %v275_v55  ;;  %v290_v57 = vsel %vm259_vm2, %v289_v56, %v286_v53 }
  0x4a   : > { %293 = vst [vmem:[%s210_s23 + $0x10] sm:$0x3f] %v290_v57 }
  0x4f   : > { %v336_v58 = vld [vmem:[%s210_s23] sm:$0xff] }
  0x50   : > { %v338_v59 = vld [vmem:[%s210_s23 + $0x8] sm:$0xff]  ;;  %337 = vst [vmem:[%s304_s30] sm:$0xff] %v336_v58 }
  0x51   : > { %v340_v60 = vld [vmem:[%s210_s23 + $0x10] sm:$0xff]  ;;  %339 = vst [vmem:[%s304_s30 + $0x10] sm:$0xff] %v338_v59 }
  0x52   : > { %341 = vst [vmem:[%s304_s30 + $0x20] sm:$0xff] %v340_v60 }
  0x53 PF: > { %s12_s15 = sadd.s32 1, %s574_s15   ;;  %s709_s9 = smov %s554_s10 }
  0x54   : > { %p9_p13 = scmp.ge.s32.totalorder %s12_s15, 6   ;;  %s710_s10 = smov %s647_s24 }
  0x55   : > { %s711_s11 = smov %s566_s13  ;;  %s712_s12 = smov %s570_s14 }
  0x56   : > { %s713_s13 = smov %s716_s16  ;;  %s714_s14 = smov %s720_s17 }
  0x57   :  { %11 = sbr.rel (!%p9_p13) target bundleno = 4 (0x4), region = 142 }

</bundles_post_ra>
